<compile_context>
chip_gen: v5e
topology: v5e:2x2
jax: 0.10.0
libtpu: 0.0.40
codegen_flags: <defaults>
</compile_context>

<pallas_src>
import math
import functools

import jax
import jax.numpy as jnp
from jax.experimental import pallas as pl
from jax.experimental.pallas import tpu as pltpu


_NEG_BIG = -1e30  # finite "-inf"


# -----------------------------------------------------------------------------
# Tiled linear kernel:  x (M, K) @ w (K, P) + b (P,) -> (M, P)
#   grid = (M-tiles, N-tiles, K-tiles); K is the "arbitrary" reduction axis,
#   f32 VMEM accumulator, bf16 MXU operands.
# -----------------------------------------------------------------------------
def _linear_kernel(x_ref, w_ref, b_ref, o_ref, acc_ref):
    kk = pl.program_id(2)

    @pl.when(kk == 0)
    def _init():
        acc_ref[...] = jnp.zeros_like(acc_ref)

    acc_ref[...] += jnp.dot(
        x_ref[...].astype(jnp.bfloat16),
        w_ref[...].astype(jnp.bfloat16),
        preferred_element_type=jnp.float32,
    )

    @pl.when(kk == pl.num_programs(2) - 1)
    def _finalize():
        o_ref[...] = (acc_ref[...] + b_ref[...]).astype(o_ref.dtype)


def _linear(x, w, b, *, out_dtype, tm=256, tn=256, tk=512):
    M, K = x.shape
    P = w.shape[-1]
    tm = min(tm, M)
    tn = min(tn, P)
    tk = min(tk, K)
    if K % tk != 0:      # keep the reduction axis exactly tiled (no OOB garbage)
        tk = K
    grid = (pl.cdiv(M, tm), pl.cdiv(P, tn), K // tk)
    return pl.pallas_call(
        _linear_kernel,
        out_shape=jax.ShapeDtypeStruct((M, P), out_dtype),
        grid=grid,
        in_specs=[
            pl.BlockSpec((tm, tk), lambda i, j, kk: (i, kk)),
            pl.BlockSpec((tk, tn), lambda i, j, kk: (kk, j)),
            pl.BlockSpec((1, tn), lambda i, j, kk: (0, j)),
        ],
        out_specs=pl.BlockSpec((tm, tn), lambda i, j, kk: (i, j)),
        scratch_shapes=[pltpu.VMEM((tm, tn), jnp.float32)],
        compiler_params=pltpu.CompilerParams(
            dimension_semantics=("parallel", "parallel", "arbitrary")
        ),
    )(x, w, b.reshape(1, P))


# -----------------------------------------------------------------------------
# Flash-style attention kernel, one (batch, head) pair per leading grid index.
#   grid = (N*H, q-tiles, kv-tiles);  kv axis is the (arbitrary) reduction.
# -----------------------------------------------------------------------------
def _flash_kernel(pad_ref, q_ref, k_ref, v_ref, o_ref,
                  m_sc, l_sc, acc_sc, *, causal, t_q, t_kv):
    qi = pl.program_id(1)
    ki = pl.program_id(2)

    @pl.when(ki == 0)
    def _init():
        m_sc[...] = jnp.full(m_sc.shape, _NEG_BIG, m_sc.dtype)
        l_sc[...] = jnp.zeros_like(l_sc)
        acc_sc[...] = jnp.zeros_like(acc_sc)

    def _compute():
        q = q_ref[0]                                   # (t_q,  d_k) bf16
        k = k_ref[0]                                   # (t_kv, d_k) bf16
        v = v_ref[0]                                   # (t_kv, d_k) bf16

        # scores = q @ k^T (contract d_k); scale already folded into wq.
        s = jax.lax.dot_general(
            q, k, (((1,), (1,)), ((), ())),
            preferred_element_type=jnp.float32)        # (t_q, t_kv) f32

        valid = pad_ref[0] != 0.0                      # (1, t_kv)
        if causal:
            row = qi * t_q + jax.lax.broadcasted_iota(jnp.int32, (t_q, t_kv), 0)
            col = ki * t_kv + jax.lax.broadcasted_iota(jnp.int32, (t_q, t_kv), 1)
            valid = jnp.logical_and(valid, col <= row)  # (t_q, t_kv)

        # Select (not additive bias): robust to OOB/NaN garbage in masked cols.
        s = jnp.where(valid, s, _NEG_BIG)
        m_prev = m_sc[...]
        m_new = jnp.maximum(m_prev, jnp.max(s, axis=-1, keepdims=True))
        alpha = jnp.exp(m_prev - m_new)
        p = jnp.exp(s - m_new)                          # (t_q, t_kv) f32
        # Fully-masked rows: keep weights at 0 so they normalize to 0 output.
        p = jnp.where(valid, p, 0.0)
        l_sc[...] = alpha * l_sc[...] + jnp.sum(p, axis=-1, keepdims=True)
        acc_sc[...] = alpha * acc_sc[...] + jnp.dot(
            p.astype(v.dtype), v, preferred_element_type=jnp.float32)
        m_sc[...] = m_new

    if causal:
        # Skip KV tiles that lie entirely above the causal diagonal.
        @pl.when(ki * t_kv <= qi * t_q + (t_q - 1))
        def _():
            _compute()
    else:
        _compute()

    @pl.when(ki == pl.num_programs(2) - 1)
    def _finalize():
        inv = pl.reciprocal(jnp.maximum(l_sc[...], 1e-30), approx=True)
        o_ref[0] = (acc_sc[...] * inv).astype(o_ref.dtype)


def _attention(qp, kp, vp, pad_mask, *, n_heads, causal, t_q=256, t_kv=512):
    """qp/kp/vp: (N*H, T, d_k) bf16; pad_mask: (N, T_in) or None."""
    BH, T_out, d_k = qp.shape
    T_in = kp.shape[1]
    N = BH // n_heads
    t_q = min(t_q, T_out)
    t_kv = min(t_kv, T_in)
    n_q = pl.cdiv(T_out, t_q)
    n_kv = pl.cdiv(T_in, t_kv)
    T_pad = n_kv * t_kv

    # Pad mask (1 = keep, 0 = mask). Zero-pad the ragged KV tail so the kernel
    # never needs an in-bounds check on the last tile.
    if pad_mask is None:
        pm = jnp.ones((N, T_in), jnp.float32)
    else:
        pm = pad_mask.astype(jnp.float32).reshape(N, T_in)
    if T_pad != T_in:
        pm = jnp.pad(pm, ((0, 0), (0, T_pad - T_in)))
    pm = pm.reshape(N, 1, T_pad)

    if causal:
        def kv_map(bh, qi, ki):
            # Clamp the block index for tiles above the diagonal so Pallas
            # re-uses the previous block -> their HBM fetch is skipped.
            last_visible = (qi * t_q + (t_q - 1)) // t_kv
            return (bh, jnp.minimum(ki, last_visible), 0)
    else:
        def kv_map(bh, qi, ki):
            return (bh, ki, 0)

    kern = functools.partial(_flash_kernel, causal=causal, t_q=t_q, t_kv=t_kv)

    # TODO(synk): for n_heads*d_k < 128 the (t_q, d_k) output store is
    # lane-sparse; production shapes (d_k >= 64-128) make it dense enough.
    return pl.pallas_call(
        kern,
        out_shape=jax.ShapeDtypeStruct((BH, T_out, d_k), qp.dtype),
        grid=(BH, n_q, n_kv),
        in_specs=[
            pl.BlockSpec((1, 1, t_kv), lambda bh, qi, ki: (bh // n_heads, 0, ki)),
            pl.BlockSpec((1, t_q, d_k), lambda bh, qi, ki: (bh, qi, 0)),
            pl.BlockSpec((1, t_kv, d_k), kv_map),
            pl.BlockSpec((1, t_kv, d_k), kv_map),
        ],
        out_specs=pl.BlockSpec((1, t_q, d_k), lambda bh, qi, ki: (bh, qi, 0)),
        scratch_shapes=[
            pltpu.VMEM((t_q, 1), jnp.float32),      # running max
            pltpu.VMEM((t_q, 1), jnp.float32),      # running sum
            pltpu.VMEM((t_q, d_k), jnp.float32),    # output accumulator
        ],
        compiler_params=pltpu.CompilerParams(
            dimension_semantics=("parallel", "parallel", "arbitrary")
        ),
    )(pm, qp, kp, vp)


# -----------------------------------------------------------------------------
# Wrapper (equivalent of MultiHeadAttention.forward)
# -----------------------------------------------------------------------------
def multi_head_attention(params, q, k, v, pad_mask=None, *, n_heads, d_k, causal):
    N, T_out, d_model = q.shape
    T_in = k.shape[1]
    P = n_heads * d_k
    scale = 1.0 / math.sqrt(d_k)

    # Fold 1/sqrt(d_k) into the query projection (exact, zero kernel cost).
    wq = params["wq"] * scale
    bq = params["bq"] * scale
    wk, bk = params["wk"], params["bk"]
    wv, bv = params["wv"], params["bv"]

    def split_heads(t, T):
        # (N*T, H*d_k) -> (N*H, T, d_k)
        return (t.reshape(N, T, n_heads, d_k)
                 .transpose(0, 2, 1, 3)
                 .reshape(N * n_heads, T, d_k))

    if q is k and k is v:
        # Self-attention: one wide fused QKV matmul (x read once).
        w_qkv = jnp.concatenate([wq, wk, wv], axis=1)       # (d_model, 3P)
        b_qkv = jnp.concatenate([bq, bk, bv], axis=0)       # (3P,)
        fused = _linear(q.reshape(N * T_out, d_model), w_qkv, b_qkv,
                        out_dtype=jnp.bfloat16)              # (N*T, 3P) bf16
        # Single reshape+transpose pass to per-head layout (no extra slicing
        # round-trip of three separate projected tensors).
        fused = fused.reshape(N, T_out, 3, n_heads, d_k).transpose(2, 0, 3, 1, 4)
        qp = fused[0].reshape(N * n_heads, T_out, d_k)
        kp = fused[1].reshape(N * n_heads, T_in, d_k)
        vp = fused[2].reshape(N * n_heads, T_in, d_k)
    else:
        qp = split_heads(_linear(q.reshape(N * T_out, d_model), wq, bq,
                                 out_dtype=jnp.bfloat16), T_out)
        kp = split_heads(_linear(k.reshape(N * T_in, d_model), wk, bk,
                                 out_dtype=jnp.bfloat16), T_in)
        vp = split_heads(_linear(v.reshape(N * T_in, d_model), wv, bv,
                                 out_dtype=jnp.bfloat16), T_in)

    A = _attention(qp, kp, vp, pad_mask, n_heads=n_heads, causal=causal)

    # (N*H, T_out, d_k) -> (N*T_out, H*d_k) -> output projection (f32 out).
    A = (A.reshape(N, n_heads, T_out, d_k)
          .transpose(0, 2, 1, 3)
          .reshape(N * T_out, P))
    out = _linear(A, params["wo"], params["bo"], out_dtype=q.dtype)
    return out.reshape(N, T_out, d_model)


# -----------------------------------------------------------------------------
# Pure-JAX f32 reference (mirrors the PyTorch forward exactly)
# -----------------------------------------------------------------------------
def reference_mha(params, q, k, v, pad_mask, *, n_heads, d_k, causal):
    N, T_out, d_model = q.shape
    T_in = k.shape[1]
    qp = q @ params["wq"] + params["bq"]
    kp = k @ params["wk"] + params["bk"]
    vp = v @ params["wv"] + params["bv"]
    qp = qp.reshape(N, T_out, n_heads, d_k).transpose(0, 2, 1, 3)
    kp = kp.reshape(N, T_in, n_heads, d_k).transpose(0, 2, 1, 3)
    vp = vp.reshape(N, T_in, n_heads, d_k).transpose(0, 2, 1, 3)
    scores = jnp.einsum("nhqd,nhkd->nhqk", qp, kp) / math.sqrt(d_k)
    if pad_mask is not None:
        scores = jnp.where(pad_mask[:, None, None, :] == 0, -jnp.inf, scores)
    if causal:
        cm = jnp.tril(jnp.ones((T_out, T_in)))
        scores = jnp.where(cm[None, None] == 0, -jnp.inf, scores)
    w = jax.nn.softmax(scores, axis=-1)
    A = jnp.einsum("nhqk,nhkd->nhqd", w, vp)
    A = A.transpose(0, 2, 1, 3).reshape(N, T_out, n_heads * d_k)
    return A @ params["wo"] + params["bo"]


# -----------------------------------------------------------------------------
# Main
# -----------------------------------------------------------------------------
if __name__ == "__main__":
    d_k, d_model, n_heads, max_len = 8, 32, 4, 8
    causal = True
    N, T = 2, 8  # T <= max_len

    key = jax.random.PRNGKey(0)
    keys = jax.random.split(key, 16)

    def linear_init(kw, kb, fan_in, fan_out):
        # matches torch.nn.Linear default: U(-1/sqrt(fan_in), 1/sqrt(fan_in))
        bound = 1.0 / math.sqrt(fan_in)
        w = jax.random.uniform(kw, (fan_in, fan_out), jnp.float32, -bound, bound)
        b = jax.random.uniform(kb, (fan_out,), jnp.float32, -bound, bound)
        return w, b

    wq, bq = linear_init(keys[0], keys[1], d_model, d_k * n_heads)
    wk, bk = linear_init(keys[2], keys[3], d_model, d_k * n_heads)
    wv, bv = linear_init(keys[4], keys[5], d_model, d_k * n_heads)
    wo, bo = linear_init(keys[6], keys[7], d_k * n_heads, d_model)
    params = dict(wq=wq, bq=bq, wk=wk, bk=bk, wv=wv, bv=bv, wo=wo, bo=bo)

    # pad out the last two positions of batch element 1
    pad_mask = jnp.ones((N, T), jnp.float32).at[1, 6:].set(0.0)

    # bf16 MXU operands -> compare against the f32 reference with loose tol.
    ATOL = RTOL = 3e-2

    # ---- test 1: self-attention (fused QKV path) ----
    x = jax.random.normal(keys[8], (N, T, d_model), jnp.float32)
    out_self = multi_head_attention(
        params, x, x, x, pad_mask, n_heads=n_heads, d_k=d_k, causal=causal)
    out_self = jax.block_until_ready(out_self)
    ref_self = reference_mha(
        params, x, x, x, pad_mask, n_heads=n_heads, d_k=d_k, causal=causal)
    assert out_self.shape == (N, T, d_model)
    err = float(jnp.max(jnp.abs(out_self - ref_self)))
    assert jnp.allclose(out_self, ref_self, atol=ATOL, rtol=RTOL), \
        f"self-attention mismatch vs reference (max abs err {err})"

    # ---- test 2: distinct q/k/v (separate projection path) ----
    q = jax.random.normal(keys[9], (N, T, d_model), jnp.float32)
    k = jax.random.normal(keys[10], (N, T, d_model), jnp.float32)
    v = jax.random.normal(keys[11], (N, T, d_model), jnp.float32)
    out = multi_head_attention(
        params, q, k, v, pad_mask, n_heads=n_heads, d_k=d_k, causal=causal)
    out = jax.block_until_ready(out)
    ref = reference_mha(
        params, q, k, v, pad_mask, n_heads=n_heads, d_k=d_k, causal=causal)
    err = float(jnp.max(jnp.abs(out - ref)))
    assert jnp.allclose(out, ref, atol=ATOL, rtol=RTOL), \
        f"cross-attention mismatch vs reference (max abs err {err})"

    print("KERNEL_OK")
</pallas_src>

<mosaic_0001>
module attributes {stable_mosaic.version = 11 : i64} {
  func.func @_linear_kernel(%arg0: i32, %arg1: i32, %arg2: i32, %arg3: memref<16x32xf32, #tpu.memory_space<vmem>>, %arg4: memref<32x96xf32, #tpu.memory_space<vmem>>, %arg5: memref<1x96xf32, #tpu.memory_space<vmem>>, %arg6: memref<16x96xbf16, #tpu.memory_space<vmem>>, %arg7: memref<16x96xf32, #tpu.memory_space<vmem>>) attributes {dimension_semantics = [#tpu.dimension_semantics<parallel>, #tpu.dimension_semantics<parallel>, #tpu.dimension_semantics<arbitrary>], iteration_bounds = array<i64: 1, 1, 1>, scalar_prefetch = 0 : i64, scratch_operands = 1 : i64, tpu.core_type = #tpu.core_type<tc>, window_params = [{transform_indices = @transform_0, window_bounds = array<i64: 16, 32>}, {transform_indices = @transform_1, window_bounds = array<i64: 32, 96>}, {transform_indices = @transform_2, window_bounds = array<i64: 1, 96>}, {transform_indices = @transform_3, window_bounds = array<i64: 16, 96>}]} {
    %c0_i32 = arith.constant 0 : i32
    %0 = arith.cmpi eq, %arg2, %c0_i32 : i32
    %1 = arith.extui %0 : i1 to i32
    %c0_i32_0 = arith.constant 0 : i32
    %2 = arith.cmpi ne, %1, %c0_i32_0 : i32
    scf.if %2 {
      %cst_10 = arith.constant 0.000000e+00 : f32
      %14 = vector.broadcast %cst_10 : f32 to vector<16x96xf32>
      %c0_11 = arith.constant 0 : index
      %c0_12 = arith.constant 0 : index
      %15 = vector.load %arg7[%c0_11, %c0_12] : memref<16x96xf32, #tpu.memory_space<vmem>>, vector<16x96xf32>
      tpu.vector_store %arg7[%c0_11, %c0_12], %14 {strides = array<i32>} : memref<16x96xf32, #tpu.memory_space<vmem>>, vector<16x96xf32>,
    } else {
    }
    %c0 = arith.constant 0 : index
    %c0_1 = arith.constant 0 : index
    %3 = vector.load %arg7[%c0, %c0_1] : memref<16x96xf32, #tpu.memory_space<vmem>>, vector<16x96xf32>
    %c0_2 = arith.constant 0 : index
    %c0_3 = arith.constant 0 : index
    %4 = vector.load %arg3[%c0_2, %c0_3] : memref<16x32xf32, #tpu.memory_space<vmem>>, vector<16x32xf32>
    %5 = arith.truncf %4 : vector<16x32xf32> to vector<16x32xbf16>
    %c0_4 = arith.constant 0 : index
    %c0_5 = arith.constant 0 : index
    %6 = vector.load %arg4[%c0_4, %c0_5] : memref<32x96xf32, #tpu.memory_space<vmem>>, vector<32x96xf32>
    %7 = arith.truncf %6 : vector<32x96xf32> to vector<32x96xbf16>
    %cst = arith.constant dense<0.000000e+00> : vector<16x96xf32>
    %8 = tpu.matmul %5, %7, %cst {dimension_numbers = #tpu.dot_dimension_numbers<[1], [0], [0], [1], [0, 0, 1, 1], [], []>} : vector<16x32xbf16>, vector<32x96xbf16>, vector<16x96xf32> -> vector<16x96xf32>
    %9 = arith.addf %3, %8 : vector<16x96xf32>
    %c0_6 = arith.constant 0 : index
    %c0_7 = arith.constant 0 : index
    %10 = vector.load %arg7[%c0_6, %c0_7] : memref<16x96xf32, #tpu.memory_space<vmem>>, vector<16x96xf32>
    tpu.vector_store %arg7[%c0_6, %c0_7], %9 {strides = array<i32>} : memref<16x96xf32, #tpu.memory_space<vmem>>, vector<16x96xf32>,
    %c0_i32_8 = arith.constant 0 : i32
    %11 = arith.cmpi eq, %arg2, %c0_i32_8 : i32
    %12 = arith.extui %11 : i1 to i32
    %c0_i32_9 = arith.constant 0 : i32
    %13 = arith.cmpi ne, %12, %c0_i32_9 : i32
    scf.if %13 {
      %c0_10 = arith.constant 0 : index
      %c0_11 = arith.constant 0 : index
      %14 = vector.load %arg7[%c0_10, %c0_11] : memref<16x96xf32, #tpu.memory_space<vmem>>, vector<16x96xf32>
      %c0_12 = arith.constant 0 : index
      %c0_13 = arith.constant 0 : index
      %15 = vector.load %arg5[%c0_12, %c0_13] : memref<1x96xf32, #tpu.memory_space<vmem>>, vector<1x96xf32>
      %16 = vector.broadcast %15 : vector<1x96xf32> to vector<16x96xf32>
      %17 = arith.addf %14, %16 : vector<16x96xf32>
      %18 = arith.truncf %17 : vector<16x96xf32> to vector<16x96xbf16>
      %c0_14 = arith.constant 0 : index
      %c0_15 = arith.constant 0 : index
      %19 = vector.load %arg6[%c0_14, %c0_15] : memref<16x96xbf16, #tpu.memory_space<vmem>>, vector<16x96xbf16>
      tpu.vector_store %arg6[%c0_14, %c0_15], %18 {strides = array<i32>} : memref<16x96xbf16, #tpu.memory_space<vmem>>, vector<16x96xbf16>,
    } else {
    }
    return
  }
  func.func @transform_0(%arg0: i32, %arg1: i32, %arg2: i32) -> (i32, i32) {
    %c0_i32 = arith.constant 0 : i32
    return %arg0, %arg2 : i32, i32
  }
  func.func @transform_1(%arg0: i32, %arg1: i32, %arg2: i32) -> (i32, i32) {
    %c0_i32 = arith.constant 0 : i32
    return %arg2, %arg1 : i32, i32
  }
  func.func @transform_2(%arg0: i32, %arg1: i32, %arg2: i32) -> (i32, i32) {
    %c0_i32 = arith.constant 0 : i32
    %c0_i32_0 = arith.constant 0 : i32
    return %c0_i32, %arg1 : i32, i32
  }
  func.func @transform_3(%arg0: i32, %arg1: i32, %arg2: i32) -> (i32, i32) {
    %c0_i32 = arith.constant 0 : i32
    return %arg0, %arg1 : i32, i32
  }
}

</mosaic_0001>

<bundles_post_ra>
// kernel: tpu_custom_call.1
= control target key start
LH: loop header
LB: loop body
LE: loop exit
PB: predicated region body
PF: predicated region fallthrough
CT: control target
= control target key end

     0   :  { %8 = vsyncpa [#allocation4], 0  ;;  %s257_s0 = inlined_call_operand.hbm [shape: f32[16,32], index: 0, kind: input, shape index: {}]   ;;  %s258_s1 = inlined_call_operand.hbm [shape: f32[32,96], index: 1, kind: input, shape index: {}]   ;;  %s259_s2 = inlined_call_operand.vmem [shape: f32[1,96], index: 2, kind: input, shape index: {}]   ;;  %s260_s3 = inlined_call_operand.hbm [shape: bf16[16,96], index: 3, kind: output, shape index: {}]  }
   0x1   :  { %9 = vsyncpa [#allocation7], 0 }
   0x2   :  { %10 = vsyncpa [#allocation5], 0  ;;  %s15_s14 = sshll.u32 %s257_s0, 4  ;;  %s213_s15 = smov [#allocation3]   ;;  %s16_s14 = int_to_ptr.hbm [resolvable:$true] %s15_s14 }
   0x3   :  { %s17_s16 = sshll.u32 %s213_s15, 4  ;;  %s28_s19 = sshll.u32 %s258_s1, 4  ;;  %s18_s16 = int_to_ptr.vmem [resolvable:$true] %s17_s16  ;;  %s29_s19 = int_to_ptr.hbm [resolvable:$true] %s28_s19 }
   0x4   :  { %s214_s20 = smov 128   ;;  %s215_s21 = smov 8  }
   0x5   :  { %23 = dma.hbm_to_vmem [thread:$0]  %s16_s14, 256, %s18_s16, [#allocation4], %s214_s20, %s214_s20, %s215_s21  }
   0x6   :  { %s216_s22 = smov [#allocation6]  }
   0x7   :  { %s30_s23 = sshll.u32 %s216_s22, 4  ;;  %s31_s23 = int_to_ptr.vmem [resolvable:$true] %s30_s23 }
   0x8   :  { %36 = dma.hbm_to_vmem [thread:$0]  %s29_s19, 512, %s31_s23, [#allocation7], %s214_s20, %s214_s20, %s215_s21  }
   0x9   :  { %207 = dma.done.wait [#allocation4], 256  }
   0xa   :  { %208 = vsyncadd [#allocation4], 4294967040 }
   0xb   :  { %209 = dma.done.wait [#allocation7], 512  }
   0xc   :  { %210 = vsyncadd [#allocation7], 4294966784  ;;  %vm52_vm0 = vcmask 785408   ;;  %v217_v0 = vmov 0.0   ;;  %v62_v1 = vld [vmem:[#allocation6 + $0x10] sm:$0xff]  ;;  %v63_v2 = vld [vmem:[#allocation6 + $0x18] sm:$0xff] }
   0xd   :  { %53 = vst.msk [vmem:[#allocation2] sm:$0xff] %vm52_vm0, %v217_v0  ;;  %v60_v3 = vld [vmem:[#allocation6] sm:$0xff]  ;;  %v65_v4 = vpack.c.bf16 %v63_v2, %v62_v1  ;;  %v61_v5 = vld [vmem:[#allocation6 + $0x8] sm:$0xff]  ;;  %v57_v7 = vld [vmem:[#allocation3] sm:$0xff]  ;;  %vm66_vm1 = vcmask 261120   ;;  %vm102_vm2 = vcmask 781312  }
   0xe   :  { %54 = vst.msk [vmem:[#allocation2 + $0x8] sm:$0xff] %vm52_vm0, %v217_v0  ;;  %v64_v6 = vpack.c.bf16 %v61_v5, %v60_v3  ;;  %v58_v8 = vld [vmem:[#allocation3 + $0x8] sm:$0xff]  ;;  %v134_v14 = vld [vmem:[%s259_s2] ss:$0 sm:$0xff]  ;;  %s218_s24 = smov [#allocation8]   ;;  %s111_s28 = sshll.u32 %s260_s3, 4  ;;  %s112_s28 = int_to_ptr.hbm [resolvable:$true] %s111_s28 }
   0xf   :  { %76 = vmatpush.bf16.msra.mxu0 %v65_v4  ;;  %v59_v9 = vpack.c.bf16 %v58_v8, %v57_v7  ;;  %s109_s25 = sshll.u32 %s218_s24, 4  ;;  %s219_s2 = smov 64   ;;  %s110_s25 = int_to_ptr.vmem [resolvable:$true] %s109_s25 }
  0x10   :  { %s220_s29 = smov 4  }
  0x13   :  { %77 = vmatpush.bf16.msra.mxu0 %v64_v6 }
  0x14   :  { %v55_v10 = vld [vmem:[#allocation2] sm:$0xff] }
  0x15   :  { %v56_v13 = vld [vmem:[#allocation2 + $0x8] sm:$0xff] }
  0x16   :  { %125 = vmatmul.msk.bf16.vlgmr.msra.gmra.mxu0 %vm66_vm1, %v59_v9 }
  0x93   :  { %v79_v11 = vpop.f32.mrf.mxu0 }
  0x94   :  { %v84_v12 = vadd.f32 %v79_v11, %v55_v10 }
  0x96   :  { %87 = vst.msk [vmem:[#allocation2] sm:$0xff] %vm52_vm0, %v84_v12 }
  0x9b   :  { %v81_v15 = vpop.f32.mrf.mxu0 }
  0x9c   :  { %v85_v16 = vadd.f32 %v81_v15, %v56_v13 }
  0x9d   :  { %v92_v17 = vld [vmem:[#allocation2] sm:$0xff] }
  0x9e   :  { %88 = vst.msk [vmem:[#allocation2 + $0x8] sm:$0xff] %vm52_vm0, %v85_v16  ;;  %v98_v18 = vadd.f32 %v134_v14, %v92_v17 }
  0xa0   :  { %v100_v19 = vpack.c.bf16 %v98_v18, %v98_v18 }
  0xa2   :  { %103 = vst.msk [vmem:[#allocation8] sm:$0xf] %vm102_vm2, %v100_v19 }
  0xa5   :  { %v93_v20 = vld [vmem:[#allocation2 + $0x8] sm:$0xff] }
  0xa6   :  { %v99_v21 = vadd.f32 %v134_v14, %v93_v20 }
  0xa8   :  { %v101_v22 = vpack.c.bf16 %v99_v21, %v99_v21 }
  0xaa   :  { %104 = vst.msk [vmem:[#allocation8 + $0x4] sm:$0xf] %vm102_vm2, %v101_v22 }
  0xab   :  { %117 = dma.vmem_to_hbm [thread:$0]  %s110_s25, 128, %s112_s28, [#allocation5], %s219_s2, %s219_s2, %s220_s29  }
  0xac   :  { %211 = dma.done.wait [#allocation5], 128  }
  0xad   :  { %212 = vsyncadd [#allocation5], 4294967168 }
  0xae   :  { %122 = vsyncpa [#allocation4], 1 }
  0xaf   :  { %123 = vsyncpa [#allocation7], 1 }
  0xb0   :  { %124 = vsyncpa [#allocation5], 1 }

</bundles_post_ra>
